<compile_context>
chip_gen: v7x
topology: tpu7x:2x2x1
jax: 0.10.0
libtpu: 0.0.40
codegen_flags: <defaults>
</compile_context>

<pallas_src>
import functools
import math

import jax
import jax.numpy as jnp
from jax.experimental import pallas as pl
from jax.experimental.pallas import tpu as pltpu

_LANE = 128
_BF16_SUBLANE_PACK = 16  # bf16 packs 16 rows per vreg sublane group


def _round_up(n: int, m: int) -> int:
    return ((n + m - 1) // m) * m


# ----------------------------------------------------------------------------
# Kernel:  h = x;  for each layer i: h = act(h @ W_i + b_i)   (no act on last)
# refs = (x_ref, w0, b0, w1, b1, ..., w_{L-1}, b_{L-1}, o_ref)
# ----------------------------------------------------------------------------
def _mlp_fused_kernel(*refs, n_layers: int, activation: str):
    x_ref = refs[0]
    o_ref = refs[-1]
    w_refs = refs[1:-1:2]
    b_refs = refs[2:-1:2]

    h = x_ref[...]                                        # (tb, D0) bf16
    for i in range(n_layers):
        y = jnp.dot(h, w_refs[i][...],
                    preferred_element_type=jnp.float32) + b_refs[i][...]
        if i < n_layers - 1:
            if activation == "relu":
                y = jnp.maximum(y, 0.0)
            else:  # sigmoid; padded cols give 0.5 but next layer's padded
                   # weight ROWS are exactly zero, so they contribute nothing.
                y = jax.nn.sigmoid(y)
            h = y.astype(jnp.bfloat16)                    # bf16 between layers
        else:
            o_ref[...] = y.astype(o_ref.dtype)


# ----------------------------------------------------------------------------
# Wrapper helpers
# ----------------------------------------------------------------------------
def _choose_batch_tile(B: int, batch_tile: int = 256) -> int:
    """Pick a batch tile: MXU-filling, low last-tile waste, >=2 grid steps
    for the v7x megacore when there is enough work."""
    b16 = _round_up(max(B, 1), _BF16_SUBLANE_PACK)
    if b16 <= batch_tile:
        if b16 >= 256:  # enough rows: split across the two v7x TensorCores
            return _round_up(b16 // 2, _BF16_SUBLANE_PACK)
        return b16
    # Large batch: prefer 256-row tiles (fills v6e/v7x 256x256 MXU); fall back
    # to 128 only when it clearly reduces padded-row waste in the last tile.
    pad256 = _round_up(B, 256) - B
    pad128 = _round_up(B, 128) - B
    return 128 if (pad128 + 64) <= pad256 else 256


def _const_block_spec(shape, single_buffer: bool) -> pl.BlockSpec:
    """BlockSpec for a grid-invariant (resident) operand."""
    index_map = lambda m: (0,) * len(shape)
    if single_buffer:
        try:
            return pl.BlockSpec(shape, index_map, pipeline_mode=pl.Buffered(1))
        except Exception:
            pass  # older BlockSpec without pipeline_mode: fall through
    return pl.BlockSpec(shape, index_map)


def _device_vmem_capacity() -> int:
    try:
        return int(getattr(pltpu.get_tpu_info(), "vmem_capacity_bytes",
                           64 << 20))
    except Exception:
        return 64 << 20  # conservative (v7x per-TC size); safe everywhere


# ----------------------------------------------------------------------------
# Fused forward
#   x2d:        (B, In) float32            (already flattened)
#   weights_p:  list of (in_p, out_p) bf16 (lane-padded, zero-padded)
#   biases_p:   list of (1, out_p)  f32    (lane-padded, zero-padded)
# Returns padded output (Bp, out_p) f32; caller slices.
# ----------------------------------------------------------------------------
def mlp_forward_fused(x2d, weights_p, biases_p, *, activation: str,
                      batch_tile: int = 256):
    B, In = x2d.shape
    n_layers = len(weights_p)
    dims_p = [weights_p[0].shape[0]] + [w.shape[1] for w in weights_p]

    tb = _choose_batch_tile(B, batch_tile)
    Bp = _round_up(B, tb)
    grid_m = Bp // tb

    # --- input: bf16, padded only when needed ---------------------------------
    xb = x2d.astype(jnp.bfloat16)
    pad_b, pad_d = Bp - B, dims_p[0] - In
    if pad_b or pad_d:
        xb = jnp.pad(xb, ((0, pad_b), (0, pad_d)))

    # Single-buffer resident params once their footprint is large enough that
    # the saved VMEM matters (always safe correctness-wise).
    param_bytes = (sum(int(w.size) * 2 for w in weights_p)
                   + sum(int(b.size) * 4 for b in biases_p))
    single_buffer_params = param_bytes >= (2 << 20)
    param_buf = 1 if single_buffer_params else 2

    # --- specs -----------------------------------------------------------------
    in_specs = [pl.BlockSpec((tb, dims_p[0]), lambda m: (m, 0))]
    operands = [xb]
    for i in range(n_layers):
        in_specs.append(_const_block_spec((dims_p[i], dims_p[i + 1]),
                                          single_buffer_params))
        in_specs.append(_const_block_spec((1, dims_p[i + 1]),
                                          single_buffer_params))
        operands.append(weights_p[i])
        operands.append(biases_p[i])
    out_spec = pl.BlockSpec((tb, dims_p[-1]), lambda m: (m, 0))

    # --- tight VMEM budget, capped by device capacity ---------------------------
    vmem_needed = 2 * tb * dims_p[0] * 2           # bf16 x tile, double-buffered
    vmem_needed += 2 * tb * dims_p[-1] * 4         # f32 out tile, double-buffered
    act_live = 0
    for i in range(n_layers):
        vmem_needed += param_buf * dims_p[i] * dims_p[i + 1] * 2   # bf16 W
        vmem_needed += param_buf * 8 * dims_p[i + 1] * 4           # bias tile
        act_live = max(act_live, tb * (dims_p[i] * 2 + dims_p[i + 1] * 4))
    vmem_needed += act_live

    vmem_cap = _device_vmem_capacity()
    vmem_limit = max(int(vmem_needed * 1.25) + (4 << 20), 16 << 20)
    vmem_limit = min(vmem_limit, int(vmem_cap * 0.85))
    # TODO(synk): if vmem_needed exceeds ~85% of device VMEM (very large hidden
    # dims on v7x's 64 MiB), stream the largest layer's weights over a K/N grid
    # axis instead of keeping every layer resident.

    # --- cost estimate -----------------------------------------------------------
    flops = sum(2 * Bp * dims_p[i] * dims_p[i + 1] for i in range(n_layers))
    transcendentals = 0 if activation == "relu" else Bp * sum(dims_p[1:-1])
    bytes_accessed = (int(xb.size) * 2
                      + sum(int(w.size) * 2 for w in weights_p)
                      + sum(int(b.size) * 4 for b in biases_p)
                      + Bp * dims_p[-1] * 4)

    kernel = functools.partial(_mlp_fused_kernel,
                               n_layers=n_layers, activation=activation)
    out_pad = pl.pallas_call(
        kernel,
        out_shape=jax.ShapeDtypeStruct((Bp, dims_p[-1]), jnp.float32),
        grid_spec=pltpu.PrefetchScalarGridSpec(
            num_scalar_prefetch=0,
            grid=(grid_m,),
            in_specs=in_specs,
            out_specs=out_spec,
        ),
        compiler_params=pltpu.CompilerParams(
            dimension_semantics=("parallel",),
            vmem_limit_bytes=vmem_limit,
        ),
        cost_estimate=pl.CostEstimate(
            flops=flops,
            transcendentals=transcendentals,
            bytes_accessed=bytes_accessed,
        ),
    )(*operands)
    return out_pad


@functools.partial(jax.jit, static_argnames=("activation", "output_size"))
def _mlp_apply(x, weights_p, biases_p, activation, output_size):
    x2d = x.reshape(x.shape[0], -1)                 # torch flatten(start_dim=1)
    out_pad = mlp_forward_fused(x2d, weights_p, biases_p, activation=activation)
    return out_pad[: x.shape[0], :output_size]


# ----------------------------------------------------------------------------
# MLP "module": parameters created (and padded/cast ONCE) in __init__,
# forward runs the fused Pallas kernel.  Weights stored (in, out) so the
# kernel computes y = x @ W + b.
# ----------------------------------------------------------------------------
class MLP:
    def __init__(self, input_size, hidden_sizes, output_size,
                 weight_init="uniform", source_std=0.1, activation="relu",
                 key=None):
        assert activation in ("relu", "sigmoid")
        self.input_size = input_size
        self.hidden_sizes = list(hidden_sizes)
        self.output_size = output_size
        self.activation = activation
        self.is_deep = len(hidden_sizes) > 1
        sizes = [input_size] + list(hidden_sizes) + [output_size]
        if key is None:
            key = jax.random.PRNGKey(0)

        self.weights = []     # original f32 (in, out)   -- reference math
        self.biases = []      # original f32 (out,)
        self.weights_p = []   # lane-padded bf16 (in_p, out_p) -- kernel operand
        self.biases_p = []    # lane-padded f32 (1, out_p)     -- kernel operand
        for fan_in, fan_out in zip(sizes[:-1], sizes[1:]):
            key, kw, kb = jax.random.split(key, 3)
            if weight_init == "normal":
                w = source_std * jax.random.normal(kw, (fan_in, fan_out),
                                                   dtype=jnp.float32)
                b = jnp.zeros((fan_out,), dtype=jnp.float32)
            else:
                # mimic torch.nn.Linear default init bounds
                bound = 1.0 / math.sqrt(fan_in)
                w = jax.random.uniform(kw, (fan_in, fan_out),
                                       minval=-bound, maxval=bound,
                                       dtype=jnp.float32)
                b = jax.random.uniform(kb, (fan_out,),
                                       minval=-bound, maxval=bound,
                                       dtype=jnp.float32)
            ip, op = _round_up(fan_in, _LANE), _round_up(fan_out, _LANE)
            w_p = jnp.pad(w.astype(jnp.bfloat16),
                          ((0, ip - fan_in), (0, op - fan_out)))
            b_p = jnp.pad(b, (0, op - fan_out)).reshape(1, op)
            self.weights.append(w)
            self.biases.append(b)
            self.weights_p.append(w_p)
            self.biases_p.append(b_p)

    def __call__(self, x):
        return _mlp_apply(x, self.weights_p, self.biases_p,
                          self.activation, self.output_size)


# ----------------------------------------------------------------------------
# Pure-JAX reference with identical bf16-matmul / f32-accumulate math.
# ----------------------------------------------------------------------------
def mlp_ref(model, x):
    h = x.reshape(x.shape[0], -1).astype(jnp.bfloat16)
    n = len(model.weights)
    for i in range(n):
        y = jnp.dot(h, model.weights[i].astype(jnp.bfloat16),
                    preferred_element_type=jnp.float32) + model.biases[i]
        if i < n - 1:
            y = (jnp.maximum(y, 0.0) if model.activation == "relu"
                 else jax.nn.sigmoid(y))
            h = y.astype(jnp.bfloat16)
        else:
            h = y
    return h


if __name__ == "__main__":
    key = jax.random.PRNGKey(0)
    k_x, k_m = jax.random.split(key)

    # Input: NCHW tensor, flattened inside forward (like torch flatten(1)).
    B, C, H, W = 2, 4, 16, 16
    x = jax.random.normal(k_x, (B, C, H, W), dtype=jnp.float32)

    input_size = C * H * W        # 1024
    hidden_sizes = [128, 64]      # deep MLP (2 hidden layers)
    output_size = 8

    model = MLP(input_size, hidden_sizes, output_size,
                weight_init="normal", source_std=0.1,
                activation="relu", key=k_m)

    out = jax.block_until_ready(model(x))
    ref = mlp_ref(model, x)

    assert out.shape == (B, output_size), out.shape
    assert jnp.allclose(out, ref, atol=5e-3, rtol=5e-3), "mismatch vs reference"

    print("KERNEL_OK")
</pallas_src>

<mosaic_0001>
module attributes {stable_mosaic.version = 11 : i64} {
  func.func @_mlp_fused_kernel(%arg0: i32, %arg1: memref<16x1024xbf16, #tpu.memory_space<vmem>>, %arg2: memref<1024x128xbf16, #tpu.memory_space<vmem>>, %arg3: memref<1x128xf32, #tpu.memory_space<vmem>>, %arg4: memref<128x128xbf16, #tpu.memory_space<vmem>>, %arg5: memref<1x128xf32, #tpu.memory_space<vmem>>, %arg6: memref<128x128xbf16, #tpu.memory_space<vmem>>, %arg7: memref<1x128xf32, #tpu.memory_space<vmem>>, %arg8: memref<16x128xf32, #tpu.memory_space<vmem>>) attributes {dimension_semantics = [#tpu.dimension_semantics<parallel>], iteration_bounds = array<i64: 1>, scalar_prefetch = 0 : i64, scratch_operands = 0 : i64, tpu.core_type = #tpu.core_type<tc>, window_params = [{transform_indices = @transform_0, window_bounds = array<i64: 16, 1024>}, {pipeline_mode = #tpu.pipeline_mode<synchronous>, transform_indices = @transform_1, window_bounds = array<i64: 1024, 128>}, {pipeline_mode = #tpu.pipeline_mode<synchronous>, transform_indices = @transform_2, window_bounds = array<i64: 1, 128>}, {pipeline_mode = #tpu.pipeline_mode<synchronous>, transform_indices = @transform_3, window_bounds = array<i64: 128, 128>}, {pipeline_mode = #tpu.pipeline_mode<synchronous>, transform_indices = @transform_4, window_bounds = array<i64: 1, 128>}, {pipeline_mode = #tpu.pipeline_mode<synchronous>, transform_indices = @transform_5, window_bounds = array<i64: 128, 128>}, {pipeline_mode = #tpu.pipeline_mode<synchronous>, transform_indices = @transform_6, window_bounds = array<i64: 1, 128>}, {transform_indices = @transform_7, window_bounds = array<i64: 16, 128>}]} {
    %c0 = arith.constant 0 : index
    %c0_0 = arith.constant 0 : index
    %0 = vector.load %arg1[%c0, %c0_0] : memref<16x1024xbf16, #tpu.memory_space<vmem>>, vector<16x1024xbf16>
    %c0_1 = arith.constant 0 : index
    %c0_2 = arith.constant 0 : index
    %1 = vector.load %arg2[%c0_1, %c0_2] : memref<1024x128xbf16, #tpu.memory_space<vmem>>, vector<1024x128xbf16>
    %cst = arith.constant dense<0.000000e+00> : vector<16x128xf32>
    %2 = tpu.matmul %0, %1, %cst {dimension_numbers = #tpu.dot_dimension_numbers<[1], [0], [0], [1], [0, 0, 1, 1], [], []>} : vector<16x1024xbf16>, vector<1024x128xbf16>, vector<16x128xf32> -> vector<16x128xf32>
    %c0_3 = arith.constant 0 : index
    %c0_4 = arith.constant 0 : index
    %3 = vector.load %arg3[%c0_3, %c0_4] : memref<1x128xf32, #tpu.memory_space<vmem>>, vector<1x128xf32>
    %4 = vector.broadcast %3 : vector<1x128xf32> to vector<16x128xf32>
    %5 = arith.addf %2, %4 : vector<16x128xf32>
    %cst_5 = arith.constant 0.000000e+00 : f32
    %6 = vector.broadcast %cst_5 : f32 to vector<16x128xf32>
    %7 = arith.maximumf %5, %6 : vector<16x128xf32>
    %8 = arith.truncf %7 : vector<16x128xf32> to vector<16x128xbf16>
    %c0_6 = arith.constant 0 : index
    %c0_7 = arith.constant 0 : index
    %9 = vector.load %arg4[%c0_6, %c0_7] : memref<128x128xbf16, #tpu.memory_space<vmem>>, vector<128x128xbf16>
    %cst_8 = arith.constant dense<0.000000e+00> : vector<16x128xf32>
    %10 = tpu.matmul %8, %9, %cst_8 {dimension_numbers = #tpu.dot_dimension_numbers<[1], [0], [0], [1], [0, 0, 1, 1], [], []>} : vector<16x128xbf16>, vector<128x128xbf16>, vector<16x128xf32> -> vector<16x128xf32>
    %c0_9 = arith.constant 0 : index
    %c0_10 = arith.constant 0 : index
    %11 = vector.load %arg5[%c0_9, %c0_10] : memref<1x128xf32, #tpu.memory_space<vmem>>, vector<1x128xf32>
    %12 = vector.broadcast %11 : vector<1x128xf32> to vector<16x128xf32>
    %13 = arith.addf %10, %12 : vector<16x128xf32>
    %cst_11 = arith.constant 0.000000e+00 : f32
    %14 = vector.broadcast %cst_11 : f32 to vector<16x128xf32>
    %15 = arith.maximumf %13, %14 : vector<16x128xf32>
    %16 = arith.truncf %15 : vector<16x128xf32> to vector<16x128xbf16>
    %c0_12 = arith.constant 0 : index
    %c0_13 = arith.constant 0 : index
    %17 = vector.load %arg6[%c0_12, %c0_13] : memref<128x128xbf16, #tpu.memory_space<vmem>>, vector<128x128xbf16>
    %cst_14 = arith.constant dense<0.000000e+00> : vector<16x128xf32>
    %18 = tpu.matmul %16, %17, %cst_14 {dimension_numbers = #tpu.dot_dimension_numbers<[1], [0], [0], [1], [0, 0, 1, 1], [], []>} : vector<16x128xbf16>, vector<128x128xbf16>, vector<16x128xf32> -> vector<16x128xf32>
    %c0_15 = arith.constant 0 : index
    %c0_16 = arith.constant 0 : index
    %19 = vector.load %arg7[%c0_15, %c0_16] : memref<1x128xf32, #tpu.memory_space<vmem>>, vector<1x128xf32>
    %20 = vector.broadcast %19 : vector<1x128xf32> to vector<16x128xf32>
    %21 = arith.addf %18, %20 : vector<16x128xf32>
    %c0_17 = arith.constant 0 : index
    %c0_18 = arith.constant 0 : index
    %22 = vector.load %arg8[%c0_17, %c0_18] : memref<16x128xf32, #tpu.memory_space<vmem>>, vector<16x128xf32>
    tpu.vector_store %arg8[%c0_17, %c0_18], %21 {strides = array<i32>} : memref<16x128xf32, #tpu.memory_space<vmem>>, vector<16x128xf32>,
    return
  }
  func.func @transform_0(%arg0: i32) -> (i32, i32) {
    %c0_i32 = arith.constant 0 : i32
    %c0_i32_0 = arith.constant 0 : i32
    return %arg0, %c0_i32 : i32, i32
  }
  func.func @transform_1(%arg0: i32) -> (i32, i32) {
    %c0_i32 = arith.constant 0 : i32
    %c0_i32_0 = arith.constant 0 : i32
    %c0_i32_1 = arith.constant 0 : i32
    return %c0_i32, %c0_i32_0 : i32, i32
  }
  func.func @transform_2(%arg0: i32) -> (i32, i32) {
    %c0_i32 = arith.constant 0 : i32
    %c0_i32_0 = arith.constant 0 : i32
    %c0_i32_1 = arith.constant 0 : i32
    return %c0_i32, %c0_i32_0 : i32, i32
  }
  func.func @transform_3(%arg0: i32) -> (i32, i32) {
    %c0_i32 = arith.constant 0 : i32
    %c0_i32_0 = arith.constant 0 : i32
    %c0_i32_1 = arith.constant 0 : i32
    return %c0_i32, %c0_i32_0 : i32, i32
  }
  func.func @transform_4(%arg0: i32) -> (i32, i32) {
    %c0_i32 = arith.constant 0 : i32
    %c0_i32_0 = arith.constant 0 : i32
    %c0_i32_1 = arith.constant 0 : i32
    return %c0_i32, %c0_i32_0 : i32, i32
  }
  func.func @transform_5(%arg0: i32) -> (i32, i32) {
    %c0_i32 = arith.constant 0 : i32
    %c0_i32_0 = arith.constant 0 : i32
    %c0_i32_1 = arith.constant 0 : i32
    return %c0_i32, %c0_i32_0 : i32, i32
  }
  func.func @transform_6(%arg0: i32) -> (i32, i32) {
    %c0_i32 = arith.constant 0 : i32
    %c0_i32_0 = arith.constant 0 : i32
    %c0_i32_1 = arith.constant 0 : i32
    return %c0_i32, %c0_i32_0 : i32, i32
  }
  func.func @transform_7(%arg0: i32) -> (i32, i32) {
    %c0_i32 = arith.constant 0 : i32
    %c0_i32_0 = arith.constant 0 : i32
    return %arg0, %c0_i32 : i32, i32
  }
}

</mosaic_0001>

<bundles_post_ra>
// kernel: _mlp_apply.1
= control target key start
LH: loop header
LB: loop body
LE: loop exit
PB: predicated region body
PF: predicated region fallthrough
CT: control target
= control target key end

     0   :  { %12 = vsyncpa [#allocation3], 0  ;;  %s1355_s24 = smov [#allocation2]   ;;  %s1517_s0 = inlined_call_operand.vmem [shape: bf16[16,1024], index: 0, kind: input, shape index: {}]   ;;  %s1518_s1 = inlined_call_operand.hbm [shape: bf16[1024,128], index: 1, kind: input, shape index: {}]   ;;  %s1519_s2 = inlined_call_operand.vmem [shape: f32[1,128], index: 2, kind: input, shape index: {}]   ;;  %s1520_s3 = inlined_call_operand.vmem [shape: bf16[128,128], index: 3, kind: input, shape index: {}]   ;;  %s1521_s4 = inlined_call_operand.vmem [shape: f32[1,128], index: 4, kind: input, shape index: {}]   ;;  %s1522_s5 = inlined_call_operand.vmem [shape: bf16[128,128], index: 5, kind: input, shape index: {}]   ;;  %s1523_s6 = inlined_call_operand.vmem [shape: f32[1,128], index: 6, kind: input, shape index: {}]   ;;  %s1524_s7 = inlined_call_operand.vmem [shape: f32[16,128], index: 7, kind: output, shape index: {}]  }
   0x1   :  { %s20_s25 = sshll.u32 %s1355_s24, 4  ;;  %s1331_s28 = scalar_lea.hbm %s1518_s1, 8192  ;;  %s21_s25 = int_to_ptr.vmem [resolvable:$true] %s20_s25 }
   0x2   :  { %p1332_p0 = scmp.ne.s32.totalorder %s1518_s1, %s1331_s28  ;;  %p1335_p1 = scmp.lt.u32.totalorder %s1331_s28, %s1518_s1 }
   0x4   :  { %p1337_p2 = pnand %p1335_p1, %p1332_p0 }
   0x6   :  { %1340 = shalt.err (!%p1337_p2)
}
   0x7   :  { %s1341_s10 = scalar_lea.vmem %s21_s25, 8192  ;;  %p1346_p4 = scmp.lt.s32.totalorder %s21_s25, %s21_s25 }
   0x8   :  { %p1342_p3 = scmp.ne.s32.totalorder %s21_s25, %s1341_s10  ;;  %p1347_p5 = scmp.lt.s32.totalorder %s1341_s10, %s1341_s10 }
   0xa   :  { %p1348_p6 = por %p1347_p5, %p1346_p4 }
   0xc   :  { %p1349_p7 = pnand %p1348_p6, %p1342_p3 }
   0xe   :  { %1352 = shalt.err (!%p1349_p7)
}
   0xf   :  { %s1356_s11 = smov 64   ;;  %s1357_s12 = smov 4  }
  0x10   :  { %26 = dma.hbm_to_vmem [thread:$0]  %s1518_s1, 8192, %s21_s25, [#allocation3], %s1356_s11, %s1356_s11, %s1357_s12  }
  0x11   :  { %1353 = dma.done.wait [#allocation3], 8192  }
  0x12   :  { %1354 = vsyncadd [#allocation3], 4294959104  ;;  %v1251_v0 = vld [vmem:[#allocation2 + $0x40] sm:$0xff]   ;;  %v1255_v4 = vld [vmem:[#allocation2 + $0x48] sm:$0xff]   ;;  %vm1359_vm0 = vmmov 0  }
  0x13   :  { %v1252_v1 = vld [vmem:[#allocation2 + $0xc0] sm:$0xff]   ;;  %1100 = vmatprep.subr.bf16.mxu0 %v1251_v0  ;;  %v1256_v5 = vld [vmem:[#allocation2 + $0xc8] sm:$0xff]   ;;  %v1259_v8 = vld [vmem:[#allocation2 + $0x50] sm:$0xff]  }
  0x14   :  { %v1253_v2 = vld [vmem:[#allocation2] sm:$0xff]   ;;  %1122 = vmatprep.subr.bf16.mxu1 %v1252_v1  ;;  %v1257_v6 = vld [vmem:[#allocation2 + $0x8] sm:$0xff]   ;;  %v1260_v9 = vld [vmem:[#allocation2 + $0xd0] sm:$0xff]  }
  0x15   :  { %v1254_v3 = vld [vmem:[#allocation2 + $0x80] sm:$0xff]   ;;  %1101 = vmatpush3.bf16.msra.mxu0 %v1253_v2  ;;  %v1258_v7 = vld [vmem:[#allocation2 + $0x88] sm:$0xff]   ;;  %v1261_v10 = vld [vmem:[#allocation2 + $0x10] sm:$0xff]  }
  0x16   :  { %1123 = vmatpush3.bf16.msra.mxu1 %v1254_v3  ;;  %1102 = vmatprep.subr.bf16.mxu0 %v1255_v4  ;;  %v1262_v11 = vld [vmem:[#allocation2 + $0x90] sm:$0xff]   ;;  %v1263_v12 = vld [vmem:[#allocation2 + $0x58] sm:$0xff]   ;;  %v1267_v16 = vld [vmem:[#allocation2 + $0x60] sm:$0xff]  }
  0x17   :  { %1124 = vmatprep.subr.bf16.mxu1 %v1256_v5  ;;  %v1264_v13 = vld [vmem:[#allocation2 + $0xd8] sm:$0xff]   ;;  %v1268_v17 = vld [vmem:[#allocation2 + $0xe0] sm:$0xff]   ;;  %v1271_v20 = vld [vmem:[#allocation2 + $0x68] sm:$0xff]  }
  0x18   :  { %v1265_v14 = vld [vmem:[#allocation2 + $0x18] sm:$0xff]   ;;  %v1269_v18 = vld [vmem:[#allocation2 + $0x20] sm:$0xff]   ;;  %v1272_v21 = vld [vmem:[#allocation2 + $0xe8] sm:$0xff]  }
  0x19   :  { %1103 = vmatpush3.bf16.msra.mxu0 %v1257_v6  ;;  %v1266_v15 = vld [vmem:[#allocation2 + $0x98] sm:$0xff]   ;;  %v1270_v19 = vld [vmem:[#allocation2 + $0xa0] sm:$0xff]   ;;  %v1273_v22 = vld [vmem:[#allocation2 + $0x28] sm:$0xff]  }
  0x1a   :  { %1125 = vmatpush3.bf16.msra.mxu1 %v1258_v7  ;;  %1104 = vmatprep.subr.bf16.mxu0 %v1259_v8  ;;  %v1274_v23 = vld [vmem:[#allocation2 + $0xa8] sm:$0xff]   ;;  %v1275_v24 = vld [vmem:[#allocation2 + $0x70] sm:$0xff]   ;;  %v1279_v28 = vld [vmem:[#allocation2 + $0x78] sm:$0xff]  }
  0x1b   :  { %1126 = vmatprep.subr.bf16.mxu1 %v1260_v9  ;;  %v1276_v25 = vld [vmem:[#allocation2 + $0xf0] sm:$0xff]   ;;  %v1280_v29 = vld [vmem:[#allocation2 + $0xf8] sm:$0xff]   ;;  %v41_v32 = vld [vmem:[%s1517_s0] sm:$0xff] }
  0x1c   :  { %v1277_v26 = vld [vmem:[#allocation2 + $0x30] sm:$0xff]   ;;  %v1281_v30 = vld [vmem:[#allocation2 + $0x38] sm:$0xff]   ;;  %v45_v33 = vld [vmem:[%s1517_s0 + $0x20] sm:$0xff] }
  0x1d   :  { %1105 = vmatpush3.bf16.msra.mxu0 %v1261_v10  ;;  %v1278_v27 = vld [vmem:[#allocation2 + $0xb0] sm:$0xff]   ;;  %v1282_v31 = vld [vmem:[#allocation2 + $0xb8] sm:$0xff]   ;;  %v42_v34 = vld [vmem:[%s1517_s0 + $0x8] sm:$0xff]  ;;  %v1010_v35 = vcombine.low %v41_v32, %v45_v33  ;;  %v1011_v36 = vcombine.high %v41_v32, %v45_v33 }
  0x1e   :  { %1127 = vmatpush3.bf16.msra.mxu1 %v1262_v11  ;;  %1106 = vmatprep.subr.bf16.mxu0 %v1263_v12  ;;  %v46_v37 = vld [vmem:[%s1517_s0 + $0x28] sm:$0xff]  ;;  %v1283_v40 = vld [vmem:[#allocation2 + $0x140] sm:$0xff]   ;;  %v1291_v48 = vld [vmem:[#allocation2 + $0x150] sm:$0xff]  }
  0x1f   :  { %1128 = vmatprep.subr.bf16.mxu1 %v1264_v13  ;;  %v1012_v38 = vcombine.low %v42_v34, %v46_v37  ;;  %v1013_v39 = vcombine.high %v42_v34, %v46_v37  ;;  %640 = vmatprep.mubr.bf16.mxu0 %v1011_v36  ;;  %v1284_v41 = vld [vmem:[#allocation2 + $0x1c0] sm:$0xff]   ;;  %v1287_v44 = vld [vmem:[#allocation2 + $0x148] sm:$0xff]   ;;  %v1292_v49 = vld [vmem:[#allocation2 + $0x1d0] sm:$0xff]  }
  0x20   :  { %v1285_v42 = vld [vmem:[#allocation2 + $0x100] sm:$0xff]   ;;  %v1288_v45 = vld [vmem:[#allocation2 + $0x1c8] sm:$0xff]   ;;  %v1293_v50 = vld [vmem:[#allocation2 + $0x110] sm:$0xff]  }
  0x21   :  { %1107 = vmatpush3.bf16.msra.mxu0 %v1265_v14  ;;  %681 = vmatprep.mubr.bf16.mxu1 %v1013_v39  ;;  %v1286_v43 = vld [vmem:[#allocation2 + $0x180] sm:$0xff]   ;;  %v1289_v46 = vld [vmem:[#allocation2 + $0x108] sm:$0xff]   ;;  %v1294_v51 = vld [vmem:[#allocation2 + $0x190] sm:$0xff]  }
  0x22   :  { %1129 = vmatpush3.bf16.msra.mxu1 %v1266_v15  ;;  %1108 = vmatprep.subr.bf16.mxu0 %v1267_v16  ;;  %v1290_v47 = vld [vmem:[#allocation2 + $0x188] sm:$0xff]   ;;  %v1295_v52 = vld [vmem:[#allocation2 + $0x158] sm:$0xff]   ;;  %v1299_v56 = vld [vmem:[#allocation2 + $0x160] sm:$0xff]  }
  0x23   :  { %1130 = vmatprep.subr.bf16.mxu1 %v1268_v17  ;;  %v1296_v53 = vld [vmem:[#allocation2 + $0x1d8] sm:$0xff]   ;;  %v1300_v57 = vld [vmem:[#allocation2 + $0x1e0] sm:$0xff]   ;;  %v1303_v60 = vld [vmem:[#allocation2 + $0x168] sm:$0xff]   ;;  %v1358_v17 = vmov 0.0  }
  0x24   :  { %v1297_v54 = vld [vmem:[#allocation2 + $0x118] sm:$0xff]   ;;  %v1301_v58 = vld [vmem:[#allocation2 + $0x120] sm:$0xff]   ;;  %v1304_v61 = vld [vmem:[#allocation2 + $0x1e8] sm:$0xff]  }
  0x25   :  { %1109 = vmatpush3.bf16.msra.mxu0 %v1269_v18  ;;  %v1298_v55 = vld [vmem:[#allocation2 + $0x198] sm:$0xff]   ;;  %v1302_v59 = vld [vmem:[#allocation2 + $0x1a0] sm:$0xff]   ;;  %v1305_v62 = vld [vmem:[#allocation2 + $0x128] sm:$0xff]  }
  0x26   :  { %1131 = vmatpush3.bf16.msra.mxu1 %v1270_v19  ;;  %1110 = vmatprep.subr.bf16.mxu0 %v1271_v20  ;;  %v1306_v63 = vld [vmem:[#allocation2 + $0x1a8] sm:$0xff]   ;;  %v1307_v0 = vld [vmem:[#allocation2 + $0x170] sm:$0xff]   ;;  %v1311_v4 = vld [vmem:[#allocation2 + $0x178] sm:$0xff]  }
  0x27   :  { %1132 = vmatprep.subr.bf16.mxu1 %v1272_v21  ;;  %v1308_v1 = vld [vmem:[#allocation2 + $0x1f0] sm:$0xff]   ;;  %v1312_v5 = vld [vmem:[#allocation2 + $0x1f8] sm:$0xff]   ;;  %v1315_v16 = vld [vmem:[%s1520_s3] sm:$0xff]  }
  0x28   :  { %v1309_v2 = vld [vmem:[#allocation2 + $0x130] sm:$0xff]   ;;  %v1313_v6 = vld [vmem:[#allocation2 + $0x138] sm:$0xff]   ;;  %v1316_v18 = vld [vmem:[%s1520_s3 + $0x8] sm:$0xff]  }
  0x29   :  { %1111 = vmatpush3.bf16.msra.mxu0 %v1273_v22  ;;  %v1310_v3 = vld [vmem:[#allocation2 + $0x1b0] sm:$0xff]   ;;  %v1314_v7 = vld [vmem:[#allocation2 + $0x1b8] sm:$0xff]   ;;  %v1319_v21 = vld [vmem:[%s1520_s3 + $0x20] sm:$0xff]  }
  0x2a   :  { %1133 = vmatpush3.bf16.msra.mxu1 %v1274_v23  ;;  %1112 = vmatprep.subr.bf16.mxu0 %v1275_v24  ;;  %v43_v8 = vld [vmem:[%s1517_s0 + $0x10] sm:$0xff]  ;;  %v44_v12 = vld [vmem:[%s1517_s0 + $0x18] sm:$0xff]  ;;  %v1320_v22 = vld [vmem:[%s1520_s3 + $0x28] sm:$0xff]  }
  0x2b   :  { %1134 = vmatprep.subr.bf16.mxu1 %v1276_v25  ;;  %v47_v9 = vld [vmem:[%s1517_s0 + $0x30] sm:$0xff]  ;;  %v48_v13 = vld [vmem:[%s1517_s0 + $0x38] sm:$0xff]  ;;  %v1323_v25 = vld [vmem:[%s1522_s5] sm:$0xff]  }
  0x2c   :  { %v1014_v10 = vcombine.low %v43_v8, %v47_v9  ;;  %v1015_v11 = vcombine.high %v43_v8, %v47_v9  ;;  %v1016_v14 = vcombine.low %v44_v12, %v48_v13  ;;  %v1017_v15 = vcombine.high %v44_v12, %v48_v13  ;;  %v1317_v19 = vld [vmem:[%s1520_s3 + $0x10] sm:$0xff]   ;;  %v1318_v20 = vld [vmem:[%s1520_s3 + $0x18] sm:$0xff]   ;;  %v1009_v33 = vld [vmem:[%s1519_s2] ss:$0 sm:$0xff] }
  0x2d   :  { %1113 = vmatpush3.bf16.msra.mxu0 %v1277_v26  ;;  %v1321_v23 = vld [vmem:[%s1520_s3 + $0x30] sm:$0xff]   ;;  %v1322_v24 = vld [vmem:[%s1520_s3 + $0x38] sm:$0xff]   ;;  %v1324_v26 = vld [vmem:[%s1522_s5 + $0x8] sm:$0xff]  }
  0x2e   :  { %1135 = vmatpush3.bf16.msra.mxu1 %v1278_v27  ;;  %1114 = vmatprep.subr.bf16.mxu0 %v1279_v28  ;;  %v1325_v27 = vld [vmem:[%s1522_s5 + $0x10] sm:$0xff]   ;;  %v1326_v28 = vld [vmem:[%s1522_s5 + $0x18] sm:$0xff]  }
  0x2f   :  { %1136 = vmatprep.subr.bf16.mxu1 %v1280_v29  ;;  %v1327_v29 = vld [vmem:[%s1522_s5 + $0x20] sm:$0xff]  }
  0x31   :  { %1115 = vmatpush3.bf16.msra.mxu0 %v1281_v30  ;;  %v1328_v30 = vld [vmem:[%s1522_s5 + $0x28] sm:$0xff]  }
  0x32   :  { %1137 = vmatpush3.bf16.msra.mxu1 %v1282_v31  ;;  %1144 = vmatprep.subr.bf16.mxu0 %v1283_v40 }
  0x33   :  { %1166 = vmatprep.subr.bf16.mxu1 %v1284_v41 }
  0x34   :  { %641 = vmatmul.mubr.bf16.vlgmr.msra.gmra.mrb[0].mxu0 %v1010_v35 }
  0x35   :  { %682 = vmatmul.mubr.bf16.vlgmr.msra.gmra.mrb[0].mxu1 %v1012_v38  ;;  %1145 = vmatpush3.bf16.msra.mxu0 %v1285_v42 }
  0x36   :  { %1167 = vmatpush3.bf16.msra.mxu1 %v1286_v43  ;;  %1146 = vmatprep.subr.bf16.mxu0 %v1287_v44 }
  0x37   :  { %1168 = vmatprep.subr.bf16.mxu1 %v1288_v45  ;;  %722 = vmatprep.mubr.bf16.mxu0 %v1015_v11 }
  0x38   :  { %763 = vmatprep.mubr.bf16.mxu1 %v1017_v15  ;;  %v1091_v15 = vld [vmem:[%s1523_s6] ss:$0 sm:$0xff] }
  0x39   :  { %1147 = vmatpush3.bf16.msra.mxu0 %v1289_v46 }
  0x3a   :  { %1169 = vmatpush3.bf16.msra.mxu1 %v1290_v47  ;;  %1148 = vmatprep.subr.bf16.mxu0 %v1291_v48 }
  0x3b   :  { %1170 = vmatprep.subr.bf16.mxu1 %v1292_v49 }
  0x3d   :  { %1149 = vmatpush3.bf16.msra.mxu0 %v1293_v50 }
  0x3e   :  { %1171 = vmatpush3.bf16.msra.mxu1 %v1294_v51  ;;  %1150 = vmatprep.subr.bf16.mxu0 %v1295_v52 }
  0x3f   :  { %1172 = vmatprep.subr.bf16.mxu1 %v1296_v53 }
  0x41   :  { %1151 = vmatpush3.bf16.msra.mxu0 %v1297_v54 }
  0x42   :  { %1173 = vmatpush3.bf16.msra.mxu1 %v1298_v55  ;;  %1152 = vmatprep.subr.bf16.mxu0 %v1299_v56 }
  0x43   :  { %1174 = vmatprep.subr.bf16.mxu1 %v1300_v57 }
  0x45   :  { %1153 = vmatpush3.bf16.msra.mxu0 %v1301_v58 }
  0x46   :  { %1175 = vmatpush3.bf16.msra.mxu1 %v1302_v59  ;;  %1154 = vmatprep.subr.bf16.mxu0 %v1303_v60 }
  0x47   :  { %1176 = vmatprep.subr.bf16.mxu1 %v1304_v61 }
  0x49   :  { %1155 = vmatpush3.bf16.msra.mxu0 %v1305_v62 }
  0x4a   :  { %1177 = vmatpush3.bf16.msra.mxu1 %v1306_v63  ;;  %1156 = vmatprep.subr.bf16.mxu0 %v1307_v0 }
  0x4b   :  { %1178 = vmatprep.subr.bf16.mxu1 %v1308_v1 }
  0x4d   :  { %1157 = vmatpush3.bf16.msra.mxu0 %v1309_v2 }
  0x4e   :  { %1179 = vmatpush3.bf16.msra.mxu1 %v1310_v3  ;;  %1158 = vmatprep.subr.bf16.mxu0 %v1311_v4  ;;  %v1329_v3 = vld [vmem:[%s1522_s5 + $0x30] sm:$0xff]   ;;  %v1330_v4 = vld [vmem:[%s1522_s5 + $0x38] sm:$0xff]  }
  0x4f   :  { %1180 = vmatprep.subr.bf16.mxu1 %v1312_v5  ;;  %v1082_v5 = vld [vmem:[%s1521_s4] ss:$0 sm:$0xff] }
  0x51   :  { %1159 = vmatpush3.bf16.msra.mxu0 %v1313_v6 }
  0x52   :  { %1181 = vmatpush3.bf16.msra.mxu1 %v1314_v7  ;;  %1206 = vmatprep.subr.bf16.mxu0 %v1358_v17 }
  0x53   :  { %1226 = vmatprep.subr.bf16.mxu1 %v1358_v17 }
  0x54   :  { %723 = vmatmul.mubr.bf16.vlgmr.msra.gmra.mrb[4].mxu0 %v1014_v10 }
  0x55   :  { %764 = vmatmul.mubr.bf16.vlgmr.msra.gmra.mrb[4].mxu1 %v1016_v14  ;;  %1207 = vmatpush3.bf16.msra.mxu0 %v1315_v16 }
  0x56   :  { %1208 = vmatprep.subr.bf16.mxu0 %v1358_v17  ;;  %1222 = vmatprep.mubr.msk.bf16.mxu0 %vm1359_vm0, %v1358_v17 }
  0x57   :  { %1242 = vmatprep.mubr.msk.bf16.mxu1 %vm1359_vm0, %v1358_v17  ;;  %1227 = vmatpush3.bf16.msra.mxu1 %v1323_v25 }
  0x58   :  { %1228 = vmatprep.subr.bf16.mxu1 %v1358_v17 }
  0x59   :  { %1209 = vmatpush3.bf16.msra.mxu0 %v1316_v18 }
  0x5a   :  { %1210 = vmatprep.subr.bf16.mxu0 %v1358_v17 }
  0x5b   :  { %1229 = vmatpush3.bf16.msra.mxu1 %v1324_v26 }
  0x5c   :  { %1230 = vmatprep.subr.bf16.mxu1 %v1358_v17 }
  0x5d   :  { %1211 = vmatpush3.bf16.msra.mxu0 %v1317_v19 }
  0x5e   :  { %1212 = vmatprep.subr.bf16.mxu0 %v1358_v17 }
  0x5f   :  { %1231 = vmatpush3.bf16.msra.mxu1 %v1325_v27 }
  0x60   :  { %1232 = vmatprep.subr.bf16.mxu1 %v1358_v17 }
  0x61   :  { %1213 = vmatpush3.bf16.msra.mxu0 %v1318_v20 }
  0x62   :  { %1214 = vmatprep.subr.bf16.mxu0 %v1358_v17 }
  0x63   :  { %1233 = vmatpush3.bf16.msra.mxu1 %v1326_v28 }
  0x64   :  { %1234 = vmatprep.subr.bf16.mxu1 %v1358_v17 }
  0x65   :  { %1215 = vmatpush3.bf16.msra.mxu0 %v1319_v21 }
  0x66   :  { %1216 = vmatprep.subr.bf16.mxu0 %v1358_v17 }
  0x67   :  { %1235 = vmatpush3.bf16.msra.mxu1 %v1327_v29 }
  0x68   :  { %1236 = vmatprep.subr.bf16.mxu1 %v1358_v17 }
  0x69   :  { %1217 = vmatpush3.bf16.msra.mxu0 %v1320_v22 }
  0x6a   :  { %1218 = vmatprep.subr.bf16.mxu0 %v1358_v17 }
  0x6b   :  { %1237 = vmatpush3.bf16.msra.mxu1 %v1328_v30 }
  0x6c   :  { %1238 = vmatprep.subr.bf16.mxu1 %v1358_v17 }
  0x6d   :  { %1219 = vmatpush3.bf16.msra.mxu0 %v1321_v23 }
  0x6e   :  { %1220 = vmatprep.subr.bf16.mxu0 %v1358_v17 }
  0x6f   :  { %1239 = vmatpush3.bf16.msra.mxu1 %v1329_v3 }
  0x70   :  { %1240 = vmatprep.subr.bf16.mxu1 %v1358_v17 }
  0x71   :  { %1221 = vmatpush3.bf16.msra.mxu0 %v1322_v24 }
  0x73   :  { %1241 = vmatpush3.bf16.msra.mxu1 %v1330_v4 }
 0x107   :  { %v1116_v31 = vpop.f32.mrb[0].mxu0 }
 0x108   :  { %v1138_v32 = vpop.f32.mrb[0].mxu1  ;;  %v1117_v34 = vpop.f32.mrb[1].mxu0 }
 0x109   :  { %v1118_v35 = vadd.f32 %v1117_v34, %v1116_v31  ;;  %v1139_v36 = vpop.f32.mrb[1].mxu1  ;;  %v1119_v37 = vpop.f32.mrb[2].mxu0 }
 0x10a   :  { %v1140_v38 = vadd.f32 %v1139_v36, %v1138_v32  ;;  %v1141_v39 = vpop.f32.mrb[2].mxu1  ;;  %v1120_v40 = vpop.f32.mrb[3].mxu0 }
 0x10b   :  { %v643_v41 = vadd.f32 %v1118_v35, %v1009_v33  ;;  %v1121_v42 = vadd.f32 %v1120_v40, %v1119_v37  ;;  %v1142_v43 = vpop.f32.mrb[3].mxu1 }
 0x10c   :  { %v1143_v44 = vadd.f32 %v1142_v43, %v1141_v39 }
 0x10d   :  { %v684_v45 = vadd.f32 %v1140_v38, %v643_v41  ;;  %v646_v46 = vadd.f32 %v1121_v42, %v1009_v33 }
 0x10f   :  { %v687_v47 = vadd.f32 %v1143_v44, %v646_v46 }
 0x127   :  { %v1160_v48 = vpop.f32.mrb[4].mxu0 }
 0x128   :  { %v1182_v49 = vpop.f32.mrb[4].mxu1  ;;  %v1161_v50 = vpop.f32.mrb[5].mxu0 }
 0x129   :  { %v1162_v51 = vadd.f32 %v1161_v50, %v1160_v48  ;;  %v1183_v52 = vpop.f32.mrb[5].mxu1  ;;  %v1163_v53 = vpop.f32.mrb[6].mxu0 }
 0x12a   :  { %v1184_v54 = vadd.f32 %v1183_v52, %v1182_v49  ;;  %v1185_v55 = vpop.f32.mrb[6].mxu1  ;;  %v1164_v56 = vpop.f32.mrb[7].mxu0 }
 0x12b   :  { %v725_v57 = vadd.f32 %v1162_v51, %v684_v45  ;;  %v1165_v58 = vadd.f32 %v1164_v56, %v1163_v53  ;;  %v1186_v59 = vpop.f32.mrb[7].mxu1 }
 0x12c   :  { %v1187_v60 = vadd.f32 %v1186_v59, %v1185_v55 }
 0x12d   :  { %v766_v61 = vadd.f32 %v1184_v54, %v725_v57  ;;  %v728_v62 = vadd.f32 %v1165_v58, %v687_v47 }
 0x12f   :  { %v769_v63 = vadd.f32 %v1187_v60, %v728_v62  ;;  %v772_v0 = vmax.f32 %v766_v61, 0.0 }
 0x131   :  { %v773_v1 = vmax.f32 %v769_v63, 0.0 }
 0x133   :  { %v774_v2 = vpack.c.bf16 %v773_v1, %v772_v0 }
 0x135   :  { %1223 = vmatmul.mubr.bf16.vlgmr.msra.gmra.mrb[8].mxu0 %v774_v2 }
 0x208   :  { %v880_v6 = vpop.f32.mrb[8].mxu0 }
 0x209   :  { %v881_v7 = vadd.f32 %v1082_v5, %v880_v6  ;;  %v1224_v8 = vpop.f32.mrb[9].mxu0 }
 0x20a   :  { %v883_v9 = vpop.f32.mrb[10].mxu0 }
 0x20b   :  { %v884_v10 = vadd.f32 %v1082_v5, %v883_v9  ;;  %v1225_v11 = vpop.f32.mrb[11].mxu0  ;;  %v887_v12 = vmax.f32 %v881_v7, 0.0 }
 0x20d   :  { %v888_v13 = vmax.f32 %v884_v10, 0.0 }
 0x20f   :  { %v889_v14 = vpack.c.bf16 %v888_v13, %v887_v12 }
 0x211   :  { %1243 = vmatmul.mubr.bf16.vlgmr.msra.gmra.mrb[8].mxu1 %v889_v14 }
 0x2e4   :  { %v995_v16 = vpop.f32.mrb[8].mxu1 }
 0x2e5   :  { %v996_v17 = vadd.f32 %v1091_v15, %v995_v16  ;;  %v1244_v18 = vpop.f32.mrb[9].mxu1 }
 0x2e6   :  { %v998_v19 = vpop.f32.mrb[10].mxu1 }
 0x2e7   :  { %1002 = vst [vmem:[%s1524_s7] sm:$0xff] %v996_v17  ;;  %v999_v20 = vadd.f32 %v1091_v15, %v998_v19  ;;  %v1245_v21 = vpop.f32.mrb[11].mxu1 }
 0x2e9   :  { %1003 = vst [vmem:[%s1524_s7 + $0x8] sm:$0xff] %v999_v20 }
 0x2ea   :  { %1008 = vsyncpa [#allocation3], 1 }

</bundles_post_ra>
